<compile_context>
chip_gen: v7x
topology: tpu7x:2x2x1
jax: 0.10.0
libtpu: 0.0.40
codegen_flags: <defaults>
</compile_context>

<pallas_src>
import functools

import jax
import jax.numpy as jnp
from jax import lax
from jax.experimental import pallas as pl
from jax.experimental.pallas import tpu as pltpu


# --------------------------- fused kernel ------------------------------------

def _as_head_kernel(h_ref, wlm_ref, blm_ref,                 # inputs
                    logits_ref, idx_ref, colsum_ref,         # outputs
                    run_max, run_idx, col_acc,               # VMEM scratch
                    *, tile_v, v_real, n_vt):
    t = pl.program_id(1)          # token-tile index
    v = pl.program_id(2)          # vocab-tile index (innermost reduction)

    # ---- 1) lm_head tile: bf16 x bf16 -> f32 accumulation on the MXU ---------
    s = jnp.dot(h_ref[...], wlm_ref[...],
                preferred_element_type=jnp.float32) + blm_ref[...]   # (tt, tv)
    logits_ref[...] = s

    # ---- 2) online argmax over vocab tiles ------------------------------------
    @pl.when(v == 0)
    def _init_argmax():
        run_max[...] = jnp.full(run_max.shape, -jnp.inf, jnp.float32)
        run_idx[...] = jnp.zeros(run_idx.shape, jnp.int32)

    col = lax.broadcasted_iota(jnp.int32, s.shape, 1) + v * tile_v
    if v_real != n_vt * tile_v:
        # Mask padded vocab lanes out of the max/argmax (VPU select; hides
        # under the MXU slot).  Only emitted when padding actually exists.
        s_m = jnp.where(col < v_real, s, jnp.finfo(jnp.float32).min)
    else:
        s_m = s
    tile_max = jnp.max(s_m, axis=-1, keepdims=True)                   # (tt, 1)
    tile_idx = jnp.min(jnp.where(s_m == tile_max, col, jnp.int32(2 ** 30)),
                       axis=-1, keepdims=True)                        # first hit
    better = tile_max > run_max[...]      # strict ">" keeps first occurrence
    run_idx[...] = jnp.where(better, tile_idx, run_idx[...])
    run_max[...] = jnp.maximum(run_max[...], tile_max)

    @pl.when(v == n_vt - 1)
    def _write_idx():
        # Lane-dense (tt, 128) store instead of a masked (tt, 1) store.
        idx_ref[...] = jnp.broadcast_to(run_idx[...], idx_ref.shape)

    # ---- 3) per-batch logits column-sums over tokens (for the aspect head) ----
    # Padded vocab columns of `s` are exactly zero, so no masking is needed.
    tile_colsum = jnp.sum(s, axis=0, keepdims=True)                   # (1, tv)

    @pl.when(t == 0)
    def _set_colsum():
        col_acc[v] = tile_colsum

    @pl.when(t > 0)
    def _acc_colsum():
        col_acc[v] = col_acc[v] + tile_colsum

    # Write the running total every step; the last token-tile visit (which is
    # the last HBM write for this block, in grid order) holds the full sum.
    colsum_ref[...] = col_acc[v]


# --------------------------- wrapper ------------------------------------------

def as_forward(decoder_hidden, w_lm, b_lm, w_aspect, b_aspect,
               *, tile_t=None, tile_v=256):
    """decoder_hidden (B,T,D) -> (logits, predict, argmax_idx, aspect).

    Mirrors AS.forward's head math:
      logits  = lm_head(decoder_hidden)              # result.logits
      predict = logits.transpose(1, 2)
      argmax  = torch.max(logits, 2).indices         # fed to batch_decode
      aspect  = decoder_aspect_detector(logits.mean(1))
    """
    B, T, D = decoder_hidden.shape
    V = w_lm.shape[1]
    A = w_aspect.shape[1]

    # Tile sizing notes:
    #  * tile_t: full T here; use 128-aligned tiles at real decoder lengths.
    #  * tile_v: keep double-buffered (D*tile_v bf16 + tile_t*tile_v f32) tiles
    #    well under scoped VMEM -> 512-1024 at real D; demo uses 256 so the
    #    multi-tile online-argmax path is exercised.
    tile_t = T if tile_t is None else tile_t
    assert T % tile_t == 0, "token tile must divide T"
    n_tt = T // tile_t
    n_vt = pl.cdiv(V, tile_v)
    V_pad = n_vt * tile_v

    # bf16 activations + lm_head weights (f32 MXU accumulation); f32 bias.
    h = decoder_hidden.astype(jnp.bfloat16)
    wlm = jnp.zeros((D, V_pad), jnp.bfloat16).at[:, :V].set(
        w_lm.astype(jnp.bfloat16))
    blm = jnp.zeros((1, V_pad), jnp.float32).at[:, :V].set(
        b_lm.astype(jnp.float32).reshape(1, V))

    kernel = functools.partial(
        _as_head_kernel, tile_v=tile_v, v_real=V, n_vt=n_vt)

    logits_p, idx_p, colsum_p = pl.pallas_call(
        kernel,
        out_shape=(
            jax.ShapeDtypeStruct((B, T, V_pad), jnp.float32),   # logits
            jax.ShapeDtypeStruct((B, T, 128), jnp.int32),       # argmax (lane-dense)
            jax.ShapeDtypeStruct((B, 1, V_pad), jnp.float32),   # logits col-sums
        ),
        grid_spec=pltpu.PrefetchScalarGridSpec(
            num_scalar_prefetch=0,
            grid=(B, n_tt, n_vt),                 # vocab (reduction) innermost
            in_specs=[
                pl.BlockSpec((None, tile_t, D), lambda b, t, v: (b, t, 0)),
                pl.BlockSpec((D, tile_v),       lambda b, t, v: (0, v)),
                pl.BlockSpec((1, tile_v),       lambda b, t, v: (0, v)),
            ],
            out_specs=(
                pl.BlockSpec((None, tile_t, tile_v), lambda b, t, v: (b, t, v)),
                pl.BlockSpec((None, tile_t, 128),    lambda b, t, v: (b, t, 0)),
                pl.BlockSpec((None, 1, tile_v),      lambda b, t, v: (b, 0, v)),
            ),
            scratch_shapes=[
                pltpu.VMEM((tile_t, 1), jnp.float32),        # running max
                pltpu.VMEM((tile_t, 1), jnp.int32),          # running argmax
                pltpu.VMEM((n_vt, 1, tile_v), jnp.float32),  # per-vocab-tile colsum
            ],
        ),
        compiler_params=pltpu.CompilerParams(
            # batch axis feeds v7x's two TensorCores; token/vocab axes carry the
            # argmax/colsum accumulators so they stay "arbitrary".
            dimension_semantics=("parallel", "arbitrary", "arbitrary"),
            vmem_limit_bytes=48 * 1024 * 1024,
        ),
    )(h, wlm, blm)

    logits = logits_p[:, :, :V]                          # result.logits
    # predict = result.logits.transpose(1, 2): pure layout glue, kept in XLA.
    # TODO(synk): at real vocab size either drop it or emit a transposed
    #             out_spec from the kernel instead of re-touching the slab.
    predict = jnp.swapaxes(logits, 1, 2)
    argmax_idx = idx_p[:, :, 0]                          # token ids -> batch_decode
    # Aspect head finisher: (B, V) @ (V, 10) + bias — negligible flops, done in
    # XLA on the tiny colsum output (keeps W_aspect out of the kernel's streams).
    mean_logits = colsum_p[:, 0, :V] * (1.0 / T)
    aspect = mean_logits @ w_aspect.astype(jnp.float32) + b_aspect.astype(jnp.float32)
    return logits, predict, argmax_idx, aspect


# --------------------------- main ---------------------------------------------

if __name__ == "__main__":
    key = jax.random.PRNGKey(0)
    k1, k2, k3, k4, k5 = jax.random.split(key, 5)

    # Small stand-in shapes for the LED head: batch=2, decoder seq=8, hidden=32,
    # vocab=500 (stand-in for 50265 -- deliberately NOT a multiple of 128 so the
    # vocab padding/masking path is exercised), num_aspects=10.
    B, T, D, V, A = 2, 8, 32, 500, 10

    decoder_hidden = jax.random.normal(k1, (B, T, D), dtype=jnp.float32)
    w_lm = jax.random.normal(k2, (D, V), dtype=jnp.float32) * 0.05
    b_lm = jax.random.normal(k3, (V,), dtype=jnp.float32) * 0.01
    w_aspect = jax.random.normal(k4, (V, A), dtype=jnp.float32) * 0.05
    b_aspect = jax.random.normal(k5, (A,), dtype=jnp.float32) * 0.01

    run = jax.jit(functools.partial(as_forward, tile_v=256))
    logits, predict, argmax_idx, aspect = jax.block_until_ready(
        run(decoder_hidden, w_lm, b_lm, w_aspect, b_aspect))

    # ---- reference (plain JAX, same bf16 rounding of the matmul operands) ----
    hf = decoder_hidden.astype(jnp.bfloat16).astype(jnp.float32)
    wf = w_lm.astype(jnp.bfloat16).astype(jnp.float32)
    ref_logits = jnp.einsum("btd,dv->btv", hf, wf) + b_lm
    ref_predict = jnp.swapaxes(ref_logits, 1, 2)
    ref_aspect = jnp.mean(ref_logits, axis=1) @ w_aspect + b_aspect

    assert logits.shape == (B, T, V) and predict.shape == (B, V, T)
    assert argmax_idx.shape == (B, T) and aspect.shape == (B, A)
    assert jnp.allclose(logits, ref_logits, atol=3e-2, rtol=3e-2)
    assert jnp.allclose(predict, ref_predict, atol=3e-2, rtol=3e-2)
    assert jnp.allclose(aspect, ref_aspect, atol=3e-2, rtol=3e-2)
    # Online argmax must agree exactly with argmax over the logits the kernel
    # itself produced (first-occurrence tie-breaking, matching jnp.argmax).
    assert jnp.array_equal(argmax_idx,
                           jnp.argmax(logits, axis=-1).astype(jnp.int32))

    print("KERNEL_OK")
</pallas_src>

<mosaic_0001>
module attributes {stable_mosaic.version = 11 : i64} {
  func.func @_as_head_kernel(%arg0: i32, %arg1: i32, %arg2: i32, %arg3: memref<1x8x32xbf16, #tpu.memory_space<vmem>>, %arg4: memref<32x256xbf16, #tpu.memory_space<vmem>>, %arg5: memref<1x256xf32, #tpu.memory_space<vmem>>, %arg6: memref<1x8x256xf32, #tpu.memory_space<vmem>>, %arg7: memref<1x8x128xi32, #tpu.memory_space<vmem>>, %arg8: memref<1x1x256xf32, #tpu.memory_space<vmem>>, %arg9: memref<8x1xf32, #tpu.memory_space<vmem>>, %arg10: memref<8x1xi32, #tpu.memory_space<vmem>>, %arg11: memref<2x1x256xf32, #tpu.memory_space<vmem>>) attributes {dimension_semantics = [#tpu.dimension_semantics<parallel>, #tpu.dimension_semantics<arbitrary>, #tpu.dimension_semantics<arbitrary>], iteration_bounds = array<i64: 2, 1, 2>, scalar_prefetch = 0 : i64, scratch_operands = 3 : i64, tpu.core_type = #tpu.core_type<tc>, window_params = [{transform_indices = @transform_0, window_bounds = array<i64: 1, 8, 32>}, {transform_indices = @transform_1, window_bounds = array<i64: 32, 256>}, {transform_indices = @transform_2, window_bounds = array<i64: 1, 256>}, {transform_indices = @transform_3, window_bounds = array<i64: 1, 8, 256>}, {transform_indices = @transform_4, window_bounds = array<i64: 1, 8, 128>}, {transform_indices = @transform_5, window_bounds = array<i64: 1, 1, 256>}]} {
    %c0 = arith.constant 0 : index
    %c0_0 = arith.constant 0 : index
    %c0_1 = arith.constant 0 : index
    %0 = vector.load %arg3[%c0, %c0_0, %c0_1] : memref<1x8x32xbf16, #tpu.memory_space<vmem>>, vector<1x8x32xbf16>
    %1 = vector.shape_cast %0 : vector<1x8x32xbf16> to vector<8x32xbf16>
    %c0_2 = arith.constant 0 : index
    %c0_3 = arith.constant 0 : index
    %2 = vector.load %arg4[%c0_2, %c0_3] : memref<32x256xbf16, #tpu.memory_space<vmem>>, vector<32x256xbf16>
    %cst = arith.constant dense<0.000000e+00> : vector<8x256xf32>
    %3 = tpu.matmul %1, %2, %cst {dimension_numbers = #tpu.dot_dimension_numbers<[1], [0], [0], [1], [0, 0, 1, 1], [], []>} : vector<8x32xbf16>, vector<32x256xbf16>, vector<8x256xf32> -> vector<8x256xf32>
    %c0_4 = arith.constant 0 : index
    %c0_5 = arith.constant 0 : index
    %4 = vector.load %arg5[%c0_4, %c0_5] : memref<1x256xf32, #tpu.memory_space<vmem>>, vector<1x256xf32>
    %5 = vector.broadcast %4 : vector<1x256xf32> to vector<8x256xf32>
    %6 = arith.addf %3, %5 : vector<8x256xf32>
    %c0_6 = arith.constant 0 : index
    %c0_7 = arith.constant 0 : index
    %c0_8 = arith.constant 0 : index
    %7 = vector.load %arg6[%c0_6, %c0_7, %c0_8] : memref<1x8x256xf32, #tpu.memory_space<vmem>>, vector<1x8x256xf32>
    %8 = vector.shape_cast %7 : vector<1x8x256xf32> to vector<8x256xf32>
    %9 = vector.shape_cast %6 : vector<8x256xf32> to vector<1x8x256xf32>
    tpu.vector_store %arg6[%c0_6, %c0_7, %c0_8], %9 {strides = array<i32>} : memref<1x8x256xf32, #tpu.memory_space<vmem>>, vector<1x8x256xf32>,
    %c0_i32 = arith.constant 0 : i32
    %10 = arith.cmpi eq, %arg2, %c0_i32 : i32
    %11 = arith.extui %10 : i1 to i32
    %c0_i32_9 = arith.constant 0 : i32
    %12 = arith.cmpi ne, %11, %c0_i32_9 : i32
    scf.if %12 {
      %cst_34 = arith.constant 0xFF800000 : f32
      %54 = vector.broadcast %cst_34 : f32 to vector<8x1xf32>
      %c0_35 = arith.constant 0 : index
      %c0_36 = arith.constant 0 : index
      %55 = vector.load %arg9[%c0_35, %c0_36] : memref<8x1xf32, #tpu.memory_space<vmem>>, vector<8x1xf32>
      tpu.vector_store %arg9[%c0_35, %c0_36], %54 {strides = array<i32>} : memref<8x1xf32, #tpu.memory_space<vmem>>, vector<8x1xf32>,
      %c0_i32_37 = arith.constant 0 : i32
      %56 = vector.broadcast %c0_i32_37 : i32 to vector<8x1xi32>
      %c0_38 = arith.constant 0 : index
      %c0_39 = arith.constant 0 : index
      %57 = vector.load %arg10[%c0_38, %c0_39] : memref<8x1xi32, #tpu.memory_space<vmem>>, vector<8x1xi32>
      tpu.vector_store %arg10[%c0_38, %c0_39], %56 {strides = array<i32>} : memref<8x1xi32, #tpu.memory_space<vmem>>, vector<8x1xi32>,
    } else {
    }
    %13 = tpu.iota {dimensions = array<i32: 1>} : vector<8x256xi32>
    %c256_i32 = arith.constant 256 : i32
    %14 = arith.muli %arg2, %c256_i32 : i32
    %15 = vector.broadcast %14 : i32 to vector<8x256xi32>
    %16 = arith.addi %13, %15 : vector<8x256xi32>
    %c500_i32 = arith.constant 500 : i32
    %17 = vector.broadcast %c500_i32 : i32 to vector<8x256xi32>
    %18 = arith.cmpi slt, %16, %17 : vector<8x256xi32>
    %cst_10 = arith.constant -3.40282347E+38 : f32
    %19 = vector.broadcast %cst_10 : f32 to vector<8x256xf32>
    %20 = arith.select %18, %6, %19 : vector<8x256xi1>, vector<8x256xf32>
    %cst_11 = arith.constant dense<0xFF800000> : vector<8xf32>
    %21 = vector.multi_reduction <maximumf>, %20, %cst_11 [1] : vector<8x256xf32> to vector<8xf32>
    %22 = vector.shape_cast %21 : vector<8xf32> to vector<8x1xf32>
    %23 = vector.broadcast %22 : vector<8x1xf32> to vector<8x256xf32>
    %24 = arith.cmpf oeq, %20, %23 : vector<8x256xf32>
    %c1073741824_i32 = arith.constant 1073741824 : i32
    %25 = vector.broadcast %c1073741824_i32 : i32 to vector<8x256xi32>
    %26 = arith.select %24, %16, %25 : vector<8x256xi1>, vector<8x256xi32>
    %cst_12 = arith.constant dense<2147483647> : vector<8xi32>
    %27 = vector.multi_reduction <minsi>, %26, %cst_12 [1] : vector<8x256xi32> to vector<8xi32>
    %28 = vector.shape_cast %27 : vector<8xi32> to vector<8x1xi32>
    %c0_13 = arith.constant 0 : index
    %c0_14 = arith.constant 0 : index
    %29 = vector.load %arg9[%c0_13, %c0_14] : memref<8x1xf32, #tpu.memory_space<vmem>>, vector<8x1xf32>
    %30 = arith.cmpf ogt, %22, %29 : vector<8x1xf32>
    %c0_15 = arith.constant 0 : index
    %c0_16 = arith.constant 0 : index
    %31 = vector.load %arg10[%c0_15, %c0_16] : memref<8x1xi32, #tpu.memory_space<vmem>>, vector<8x1xi32>
    %32 = arith.select %30, %28, %31 : vector<8x1xi1>, vector<8x1xi32>
    %c0_17 = arith.constant 0 : index
    %c0_18 = arith.constant 0 : index
    %33 = vector.load %arg10[%c0_17, %c0_18] : memref<8x1xi32, #tpu.memory_space<vmem>>, vector<8x1xi32>
    tpu.vector_store %arg10[%c0_17, %c0_18], %32 {strides = array<i32>} : memref<8x1xi32, #tpu.memory_space<vmem>>, vector<8x1xi32>,
    %c0_19 = arith.constant 0 : index
    %c0_20 = arith.constant 0 : index
    %34 = vector.load %arg9[%c0_19, %c0_20] : memref<8x1xf32, #tpu.memory_space<vmem>>, vector<8x1xf32>
    %35 = arith.maximumf %34, %22 : vector<8x1xf32>
    %c0_21 = arith.constant 0 : index
    %c0_22 = arith.constant 0 : index
    %36 = vector.load %arg9[%c0_21, %c0_22] : memref<8x1xf32, #tpu.memory_space<vmem>>, vector<8x1xf32>
    tpu.vector_store %arg9[%c0_21, %c0_22], %35 {strides = array<i32>} : memref<8x1xf32, #tpu.memory_space<vmem>>, vector<8x1xf32>,
    %c1_i32 = arith.constant 1 : i32
    %37 = arith.cmpi eq, %arg2, %c1_i32 : i32
    %38 = arith.extui %37 : i1 to i32
    %c0_i32_23 = arith.constant 0 : i32
    %39 = arith.cmpi ne, %38, %c0_i32_23 : i32
    scf.if %39 {
      %c0_34 = arith.constant 0 : index
      %c0_35 = arith.constant 0 : index
      %54 = vector.load %arg10[%c0_34, %c0_35] : memref<8x1xi32, #tpu.memory_space<vmem>>, vector<8x1xi32>
      %55 = vector.shape_cast %54 : vector<8x1xi32> to vector<8x1xi32>
      %56 = vector.broadcast %55 : vector<8x1xi32> to vector<8x128xi32>
      %c0_36 = arith.constant 0 : index
      %c0_37 = arith.constant 0 : index
      %c0_38 = arith.constant 0 : index
      %57 = vector.load %arg7[%c0_36, %c0_37, %c0_38] : memref<1x8x128xi32, #tpu.memory_space<vmem>>, vector<1x8x128xi32>
      %58 = vector.shape_cast %57 : vector<1x8x128xi32> to vector<8x128xi32>
      %59 = vector.shape_cast %56 : vector<8x128xi32> to vector<1x8x128xi32>
      tpu.vector_store %arg7[%c0_36, %c0_37, %c0_38], %59 {strides = array<i32>} : memref<1x8x128xi32, #tpu.memory_space<vmem>>, vector<1x8x128xi32>,
    } else {
    }
    %cst_24 = arith.constant dense<0.000000e+00> : vector<256xf32>
    %40 = vector.multi_reduction <add>, %6, %cst_24 [0] : vector<8x256xf32> to vector<256xf32>
    %41 = vector.shape_cast %40 : vector<256xf32> to vector<1x256xf32>
    %c0_i32_25 = arith.constant 0 : i32
    %42 = arith.cmpi eq, %arg1, %c0_i32_25 : i32
    %43 = arith.extui %42 : i1 to i32
    %c0_i32_26 = arith.constant 0 : i32
    %44 = arith.cmpi ne, %43, %c0_i32_26 : i32
    scf.if %44 {
      %54 = arith.index_cast %arg2 : i32 to index
      %c0_34 = arith.constant 0 : index
      %c0_35 = arith.constant 0 : index
      %55 = vector.load %arg11[%54, %c0_34, %c0_35] : memref<2x1x256xf32, #tpu.memory_space<vmem>>, vector<1x1x256xf32>
      %56 = vector.shape_cast %55 : vector<1x1x256xf32> to vector<1x256xf32>
      %57 = vector.shape_cast %41 : vector<1x256xf32> to vector<1x1x256xf32>
      tpu.vector_store %arg11[%54, %c0_34, %c0_35], %57 {strides = array<i32>} : memref<2x1x256xf32, #tpu.memory_space<vmem>>, vector<1x1x256xf32>,
    } else {
    }
    %c0_i32_27 = arith.constant 0 : i32
    %45 = arith.cmpi sgt, %arg1, %c0_i32_27 : i32
    %46 = arith.extui %45 : i1 to i32
    %c0_i32_28 = arith.constant 0 : i32
    %47 = arith.cmpi ne, %46, %c0_i32_28 : i32
    scf.if %47 {
      %54 = arith.index_cast %arg2 : i32 to index
      %c0_34 = arith.constant 0 : index
      %c0_35 = arith.constant 0 : index
      %55 = vector.load %arg11[%54, %c0_34, %c0_35] : memref<2x1x256xf32, #tpu.memory_space<vmem>>, vector<1x1x256xf32>
      %56 = vector.shape_cast %55 : vector<1x1x256xf32> to vector<1x256xf32>
      %57 = arith.addf %56, %41 : vector<1x256xf32>
      %58 = arith.index_cast %arg2 : i32 to index
      %c0_36 = arith.constant 0 : index
      %c0_37 = arith.constant 0 : index
      %59 = vector.load %arg11[%58, %c0_36, %c0_37] : memref<2x1x256xf32, #tpu.memory_space<vmem>>, vector<1x1x256xf32>
      %60 = vector.shape_cast %59 : vector<1x1x256xf32> to vector<1x256xf32>
      %61 = vector.shape_cast %57 : vector<1x256xf32> to vector<1x1x256xf32>
      tpu.vector_store %arg11[%58, %c0_36, %c0_37], %61 {strides = array<i32>} : memref<2x1x256xf32, #tpu.memory_space<vmem>>, vector<1x1x256xf32>,
    } else {
    }
    %48 = arith.index_cast %arg2 : i32 to index
    %c0_29 = arith.constant 0 : index
    %c0_30 = arith.constant 0 : index
    %49 = vector.load %arg11[%48, %c0_29, %c0_30] : memref<2x1x256xf32, #tpu.memory_space<vmem>>, vector<1x1x256xf32>
    %50 = vector.shape_cast %49 : vector<1x1x256xf32> to vector<1x256xf32>
    %c0_31 = arith.constant 0 : index
    %c0_32 = arith.constant 0 : index
    %c0_33 = arith.constant 0 : index
    %51 = vector.load %arg8[%c0_31, %c0_32, %c0_33] : memref<1x1x256xf32, #tpu.memory_space<vmem>>, vector<1x1x256xf32>
    %52 = vector.shape_cast %51 : vector<1x1x256xf32> to vector<1x256xf32>
    %53 = vector.shape_cast %50 : vector<1x256xf32> to vector<1x1x256xf32>
    tpu.vector_store %arg8[%c0_31, %c0_32, %c0_33], %53 {strides = array<i32>} : memref<1x1x256xf32, #tpu.memory_space<vmem>>, vector<1x1x256xf32>,
    return
  }
  func.func @transform_0(%arg0: i32, %arg1: i32, %arg2: i32) -> (i32, i32, i32) {
    %c0_i32 = arith.constant 0 : i32
    %c0_i32_0 = arith.constant 0 : i32
    return %arg0, %arg1, %c0_i32 : i32, i32, i32
  }
  func.func @transform_1(%arg0: i32, %arg1: i32, %arg2: i32) -> (i32, i32) {
    %c0_i32 = arith.constant 0 : i32
    %c0_i32_0 = arith.constant 0 : i32
    return %c0_i32, %arg2 : i32, i32
  }
  func.func @transform_2(%arg0: i32, %arg1: i32, %arg2: i32) -> (i32, i32) {
    %c0_i32 = arith.constant 0 : i32
    %c0_i32_0 = arith.constant 0 : i32
    return %c0_i32, %arg2 : i32, i32
  }
  func.func @transform_3(%arg0: i32, %arg1: i32, %arg2: i32) -> (i32, i32, i32) {
    %c0_i32 = arith.constant 0 : i32
    return %arg0, %arg1, %arg2 : i32, i32, i32
  }
  func.func @transform_4(%arg0: i32, %arg1: i32, %arg2: i32) -> (i32, i32, i32) {
    %c0_i32 = arith.constant 0 : i32
    %c0_i32_0 = arith.constant 0 : i32
    return %arg0, %arg1, %c0_i32 : i32, i32, i32
  }
  func.func @transform_5(%arg0: i32, %arg1: i32, %arg2: i32) -> (i32, i32, i32) {
    %c0_i32 = arith.constant 0 : i32
    %c0_i32_0 = arith.constant 0 : i32
    return %arg0, %c0_i32, %arg2 : i32, i32, i32
  }
}

</mosaic_0001>

<bundles_post_ra>
// kernel: as_forward.1
= control target key start
LH: loop header
LB: loop body
LE: loop exit
PB: predicated region body
PF: predicated region fallthrough
CT: control target
= control target key end

     0   :  { %s1038_s18 = smov 0   ;;  %s1040_s19 = smov 0   ;;  %s1179_s0 = inlined_call_operand.vmem [shape: bf16[2,8,32], index: 0, kind: input, shape index: {}]   ;;  %s1180_s1 = inlined_call_operand.vmem [shape: bf16[32,512], index: 1, kind: input, shape index: {}]   ;;  %s1181_s2 = inlined_call_operand.vmem [shape: f32[1,512], index: 2, kind: input, shape index: {}]   ;;  %s1182_s3 = inlined_call_operand.vmem [shape: f32[2,8,512], index: 3, kind: output, shape index: {0}]   ;;  %s1183_s4 = inlined_call_operand.vmem [shape: s32[2,8,128], index: 4, kind: output, shape index: {1}]   ;;  %s1184_s5 = inlined_call_operand.vmem [shape: f32[2,1,512], index: 5, kind: output, shape index: {2}]  }
   0x1   :  { %s1042_s20 = smov 0   ;;  %s1044_s21 = smov 0  }
   0x2   :  { %s1046_s22 = smov 0   ;;  %s1048_s23 = smov 0  }
   0x3   :  { %s1050_s24 = smov 0  }
   0x4 LB: > { %s28_s25 = sadd.s32 1, %s993_s22  ;;  %s35_s26 = sadd.s32 1, %s997_s23  ;;  %s1001_s24 = sphi %s1050_s24, %s16_s24   ;;  %s997_s23 = sphi %s1048_s23, %s1190_s23   ;;  %s993_s22 = sphi %s1046_s22, %s1189_s22   ;;  %s989_s21 = sphi %s1044_s21, %s1188_s21   ;;  %s985_s20 = sphi %s1042_s20, %s1187_s20   ;;  %s981_s19 = sphi %s1040_s19, %s1186_s19   ;;  %s977_s18 = sphi %s1038_s18, %s1185_s18  }
   0x5   : > { %p29_p0 = scmp.ge.s32.totalorder %s28_s25, 2  ;;  %s70_s27 = sadd.s32 1, %s981_s19 }
   0x6   : > { %p77_p1 = scmp.ne.s32.totalorder %s981_s19, %s977_s18  ;;  %p78_p2 = scmp.eq.s32.totalorder %s1001_s24, 0 }
   0x7   : > { %s1192_s25 = smov (%p29_p0, %s28_s25), 0  ;;  %s1194_s26 = smov (!%p29_p0, %s35_s26), %s997_s23 }
   0x8   : > { %s67_s28 = ssub.s32 %s993_s22, %s1192_s25  ;;  %p79_p3 = por %p78_p2, %p77_p1 }
   0x9   : > { %p37_p4 = scmp.ge.s32.totalorder %s1194_s26, 2  ;;  %p68_p5 = scmp.eq.s32.totalorder %s67_s28, 0 }
   0xa   : > { %p851_p6 = scmp.ge.s32.totalorder %s1001_s24, 4 }
   0xb   : > { %s1196_s26 = smov (%p37_p4, %s1194_s26), 0 }
   0xc   : > { %s1087_s29 = scalar_select %p68_p5, %s981_s19, %s70_s27  }
   0xd   : > { %215 = sbr.rel (%p851_p6) target bundleno = 27 (0x1b), region = 16 }
  0x14   : > { %228 = sbr.rel (!%p79_p3) target bundleno = 27 (0x1b), region = 24  ;;  %s230_s30 = sand.u32 (%p79_p3), 1, %s981_s19  }
  0x15   : > { %s878_s6 = sshll.u32 (%p79_p3), %s993_s22, 3  ;;  %s852_s7 = sshll.u32 (%p79_p3), %s230_s30, 5 }
  0x16   : > { %s235_s10 = scalar_lea.vmem (%p79_p3), %s1180_s1, %s878_s6  ;;  %s232_s11 = scalar_lea.vmem (%p79_p3), [#allocation5], %s852_s7 }
  0x17   : > { %v269_v0 = vld [vmem:[%s235_s10] sm:$0xff] (%p79_p3)  ;;  %v271_v1 = vld [vmem:[%s235_s10 + $0x10] sm:$0xff] (%p79_p3) }
  0x18   : > { %v273_v2 = vld [vmem:[%s235_s10 + $0x20] sm:$0xff] (%p79_p3)  ;;  %270 = vst [vmem:[%s232_s11] sm:$0xff] (%p79_p3), %v269_v0  ;;  %272 = vst [vmem:[%s232_s11 + $0x8] sm:$0xff] (%p79_p3), %v271_v1  ;;  %v275_v3 = vld [vmem:[%s235_s10 + $0x30] sm:$0xff] (%p79_p3) }
  0x19   : > { %274 = vst [vmem:[%s232_s11 + $0x10] sm:$0xff] (%p79_p3), %v273_v2  ;;  %276 = vst [vmem:[%s232_s11 + $0x18] sm:$0xff] (%p79_p3), %v275_v3 }
  0x1b PF: > { %p855_p7 = scmp.ge.s32.totalorder %s1001_s24, 1  ;;  %p289_p8 = scmp.lt.s32.totalorder %s1001_s24, 5 }
  0x1d   : > { %p290_p9 = pnand %p855_p7, %p289_p8 }
  0x1e   : > { %s296_s12 = sand.u32 (!%p290_p9), 1, %s977_s18   ;;  %p357_p10 = scmp.lt.s32.totalorder (!%p290_p9), %s989_s21, 1  ;;  %v1003_v4 = vmov (!%p290_p9), 0   ;;  %vm438_vm0 = vcmask (!%p290_p9), 261120   ;;  %v408_v10 = vlaneseq (!%p290_p9) }
  0x1f   : > { %293 = sbr.rel (%p290_p9) target bundleno = 874 (0x36a), region = 66  ;;  %s856_s13 = sshll.u32 (!%p290_p9), %s296_s12, 5  ;;  %474 = vmatprep.mubr.bf16.mxu0 (!%p290_p9), %v1003_v4 }
  0x20   : > { %s1100_s14 = sshll.u32 (!%p290_p9), %s985_s20, 1  ;;  %s298_s15 = scalar_lea.vmem (!%p290_p9), [#allocation5], %s856_s13  ;;  %v1120_v11 = vshrl.u32 (!%p290_p9), %v408_v10, 7 }
  0x21   : > { %p366_p11 = scmp.lt.s32.totalorder (!%p290_p9), %s1100_s14, 3  ;;  %v940_v5 = vld [vmem:[%s298_s15 + $0x4] ss:$8 sps:$4 sm:$0xff] (!%p290_p9)   ;;  %v942_v6 = vld [vmem:[%s298_s15] ss:$8 sps:$4 sm:$0xff] (!%p290_p9)   ;;  %p870_p12 = scmp.ne.s32.totalorder (!%p290_p9), %s985_s20, 0 }
  0x22   : > { %442 = vmatprep.subr.bf16.mxu0 (!%p290_p9), %v940_v5  ;;  %v943_v7 = vld [vmem:[%s298_s15 + $0x14] ss:$8 sps:$4 sm:$0xff] (!%p290_p9)   ;;  %v945_v8 = vld [vmem:[%s298_s15 + $0x10] ss:$8 sps:$4 sm:$0xff] (!%p290_p9)   ;;  %v410_v12 = vsub.s32 (!%p290_p9), 0, %v1120_v11  ;;  %v414_v14 = vsub.s32 (!%p290_p9), 1, %v1120_v11 }
  0x23   : > { %443 = vmatpush1.bf16.msra.mxu0 (!%p290_p9), %v942_v6 }
  0x24   : > { %444 = vmatprep.subr.bf16.mxu0 (!%p290_p9), %v943_v7 }
  0x26   : > { %s1198_s21 = smov (!%p357_p10, %s989_s21), 1  ;;  %vm489_vm1 = vcmask (!%p870_p12), 7168   ;;  %v1004_v23 = vmov (!%p870_p12), -inf   ;;  %v1005_v24 = vmov (!%p870_p12), 0  }
  0x27   : > { %s367_s16 = scalar_select %p366_p11, %s1100_s14, 3  ;;  %445 = vmatpush1.bf16.msra.mxu0 %v945_v8 }
  0x28   : > { %s857_s17 = sshll.u32 %s1198_s21, 2  ;;  %s862_s27 = sshll.u32 %s1198_s21, 3  ;;  %490 = vst.msk [vmem:[#allocation2] sm:$0xff] (!%p870_p12), %vm489_vm1, %v1004_v23  ;;  %491 = vst.msk [vmem:[#allocation3] sm:$0xff] (!%p870_p12), %vm489_vm1, %v1005_v24 }
  0x29   : > { %s1108_s30 = scalar_lea.vmem %s1183_s4, %s862_s27  ;;  %s363_s8 = scalar_lea.vmem %s1179_s0, %s857_s17 }
  0x2a   : > { %s1113_s9 = sadd.s32 %s857_s17, %s367_s16  ;;  %v401_v9 = vld [vmem:[%s363_s8] sm:$0xf]  ;;  %s368_s15 = scalar_lea.vmem %s1181_s2, %s367_s16 }
  0x2b   : > { %s398_s21 = scalar_lea.vmem %s1184_s5, %s1113_s9  ;;  %869 = vmatmul.mubr.msk.bf16.vlgmr.msra.gmra.mrb[0].mxu0 %vm438_vm0, %v401_v9  ;;  %v406_v13 = vld [vmem:[%s368_s15] sm:$0x3]  ;;  %s861_s17 = sshll.u32 %s1113_s9, 3 }
  0x2c   : > { %v411_v15 = vrot.slane %v406_v13, %v410_v12  ;;  %v415_v16 = vrot.slane %v406_v13, %v414_v14  ;;  %s382_s28 = scalar_lea.vmem %s1182_s3, %s861_s17 }
  0xfc   : > { %488 = sbr.rel (%p870_p12) target bundleno = 259 (0x103), region = 74 }
  0xfe   : > { %v476_v17 = vpop.f32.mrb[0].mxu0 }
  0xff   : > { %v1131_v18 = vadd.f32 %v476_v17, %v411_v15  ;;  %v478_v19 = vpop.f32.mrb[1].mxu0 }
 0x100   : > { %v1133_v20 = vadd.f32 %v478_v19, %v415_v16  ;;  %v480_v21 = vpop.f32.mrb[2].mxu0 }
 0x101   : > { %483 = vst [vmem:[%s382_s28] sm:$0xff] %v1131_v18  ;;  %v481_v22 = vpop.f32.mrb[3].mxu0 }
 0x102   : > { %484 = vst [vmem:[%s382_s28 + $0x8] sm:$0xff] %v1133_v20 }
 0x103 PF: > { %v493_v25 = vand.u32 127, %v408_v10  ;;  %s871_s16 = sshll.u32 %s985_s20, 8  ;;  %v526_v33 = vld [vmem:[#allocation2] sm:$0xff]  ;;  %vm530_vm4 = vcmask 7168   ;;  %v528_v49 = vld [vmem:[#allocation3] sm:$0xff]  ;;  %p872_p13 = scmp.ne.s32.totalorder %s985_s20, 1 }
 0x104   : > { %v496_v26 = vstv %s871_s16  ;;  %v1006_v53 = vmov (!%p872_p13), 0  }
 0x105   : > { %v494_v27 = vadd.s32 128, %v493_v25  ;;  %v497_v28 = vadd.s32 %v496_v26, %v493_v25  ;;  %946 = vset.pattern.permute.xlu0 (!%p872_p13), %v1006_v53 }
 0x107   : > { %v498_v29 = vadd.s32 %v496_v26, %v494_v27  ;;  %vm499_vm2 = vcmp.lt.s32.totalorder %v497_v28, 500 }
 0x108   : > { %v501_v30 = vsel %vm499_vm2, %v1131_v18, -3.4028235e+38 }
 0x109   : > { %vm500_vm3 = vcmp.lt.s32.totalorder %v498_v29, 500 }
 0x10a   : > { %v502_v31 = vsel %vm500_vm3, %v1133_v20, -3.4028235e+38 }
 0x10b   : > { %v503_v32 = vmax.f32 %v501_v30, %v502_v31 }
 0x10d   : > { %504 = vmax.xlane.f32.xlu0 %v503_v32 }
 0x19a   : > { %v505_v34 = vpop.xlane.xlu0 %504 }
 0x19b   : > { %vm506_vm5 = vcmp.eq.f32.partialorder %v501_v30, %v505_v34  ;;  %vm507_vm6 = vcmp.eq.f32.partialorder %v502_v31, %v505_v34  ;;  %v533_v35 = vmax.f32 %v526_v33, %v505_v34  ;;  %vm527_vm9 = vcmp.gt.f32.partialorder %v505_v34, %v526_v33 }
 0x19c   : > { %v508_v36 = vsel %vm506_vm5, %v497_v28, 1073741824  ;;  %v509_v37 = vsel %vm507_vm6, %v498_v29, 1073741824 }
 0x19d   : > { %534 = vst.msk [vmem:[#allocation2] sm:$0xff] %vm530_vm4, %v533_v35  ;;  %vm510_vm7 = vcmp.lt.s32.totalorder %v508_v36, %v509_v37 }
 0x19e   : > { %v511_v38 = vsel %vm510_vm7, %v508_v36, %v509_v37 }
 0x19f   : > { %v513_v39 = vshra.s32 %v511_v38, 16  ;;  %v512_v41 = vand.u32 65535, %v511_v38 }
 0x1a1   : > { %v515_v40 = vcvt.s32.f32 %v513_v39  ;;  %v514_v43 = vcvt.s32.f32 %v512_v41 }
 0x1a3   : > { %516 = vmin.xlane.f32.xlu0 %v515_v40 }
 0x230   : > { %v517_v42 = vpop.xlane.xlu0 %516 }
 0x231   : > { %vm518_vm8 = vcmp.eq.f32.partialorder %v515_v40, %v517_v42  ;;  %v523_v45 = vcvt.f32.s32 %v517_v42 }
 0x232   : > { %v519_v44 = vsel %vm518_vm8, %v514_v43, inf }
 0x233   : > { %520 = vmin.xlane.f32.xlu1 %v519_v44  ;;  %v524_v47 = vshll.u32 %v523_v45, 16 }
 0x2c0   : > { %v521_v46 = vpop.xlane.xlu1 %520  ;;  %538 = sbr.rel (%p872_p13) target bundleno = 847 (0x34f), region = 78 }
 0x2c1   : > { %v522_v48 = vcvt.f32.s32 %v521_v46 }
 0x2c3   : > { %v525_v50 = vadd.s32 %v524_v47, %v522_v48 }
 0x2c5   : > { %v529_v51 = vsel %vm527_vm9, %v525_v50, %v528_v49 }
 0x2c6   : > { %531 = vst.msk [vmem:[#allocation3] sm:$0xff] %vm530_vm4, %v529_v51 }
 0x2cd   : > { %v539_v52 = vld [vmem:[#allocation3] sm:$0xff] }
 0x2ce   : > { %541 = vperm.xlu0 %946, %v539_v52  }
 0x34d   : > { %v542_v54 = vpop.permute.xlu0 %541 }
 0x34e   : > { %543 = vst [vmem:[%s1108_s30] sm:$0xff] %v542_v54 }
 0x34f PF: > { %v544_v55 = vrot.slane %v1131_v18, 4  ;;  %v550_v56 = vrot.slane %v1133_v20, 4  ;;  %v1007_v59 = vmov 1966171168   ;;  %vm582_vm10 = vcmp.lt.s32.totalorder %v408_v10, 256  ;;  %s579_s20 = scalar_lea.vmem [#allocation4], %s1100_s14 }
 0x350   : > { %v564_v60 = vunpack.c.l.s4 %v1007_v59 }
 0x351   : > { %v545_v57 = vadd.f32 %v544_v55, %v1131_v18  ;;  %v551_v58 = vadd.f32 %v550_v56, %v1133_v20 }
 0x352   : > { %v565_v1 = vunpack.c.0.s8 %v564_v60 }
 0x353   : > { %v546_v61 = vrot.slane %v545_v57, 2  ;;  %v552_v62 = vrot.slane %v551_v58, 2 }
 0x354   : > { %v568_v6 = vsub.s32 %v565_v1, %v1120_v11 }
 0x355   : > { %v547_v63 = vadd.f32 %v546_v61, %v545_v57  ;;  %v553_v0 = vadd.f32 %v552_v62, %v551_v58 }
 0x357   : > { %v548_v2 = vrot.slane %v547_v63, 1  ;;  %v554_v3 = vrot.slane %v553_v0, 1 }
 0x359   : > { %v549_v4 = vadd.f32 %v548_v2, %v547_v63  ;;  %v555_v5 = vadd.f32 %v554_v3, %v553_v0 }
 0x35b   : > { %v562_v7 = vcombine.low %v549_v4, %v555_v5 }
 0x35d   : > { %v569_v8 = vrot.slane %v562_v7, %v568_v6 }
 0x35f   : > { %v576_v9 = vrot.slane %v569_v8, %v568_v6 }
 0x361   : > { %584 = vst.msk [vmem:[%s579_s20] sm:$0x3] %vm582_vm10, %v576_v9 }
 0x368   : > { %v618_v12 = vld [vmem:[%s579_s20] sm:$0x3] }
 0x369   : > { %623 = vst.msk [vmem:[%s398_s21] sm:$0x3] %vm582_vm10, %v618_v12 }
 0x36a PF: > { %s16_s24 = sadd.s32 1, %s1001_s24   ;;  %s1185_s18 = smov %s981_s19 }
 0x36b   : > { %p13_p0 = scmp.ge.s32.totalorder %s16_s24, 6   ;;  %s1186_s19 = smov %s1087_s29 }
 0x36c   : > { %s1187_s20 = smov %s993_s22  ;;  %s1188_s21 = smov %s997_s23 }
 0x36d   : > { %s1189_s22 = smov %s1192_s25  ;;  %s1190_s23 = smov %s1196_s26 }
 0x36e   :  { %15 = sbr.rel (!%p13_p0) target bundleno = 4 (0x4), region = 154 }

</bundles_post_ra>
